<compile_context>
chip_gen: v5e
topology: v5e:2x2
jax: 0.10.0
libtpu: 0.0.40
codegen_flags: <defaults>
</compile_context>

<pallas_src>
import functools

import jax
import jax.numpy as jnp
from jax.experimental import pallas as pl
from jax.experimental.pallas import tpu as pltpu

EPSILON = 1e-07
_NEG_LARGE = -1e30  # finite "minus infinity" for padded class columns / rows


def _round_up(x, m):
    return (x + m - 1) // m * m


def _f1_loss_kernel(logits_ref, labels_ref, out_ref,
                    tp_ref, s_ref, cnt_ref, *, num_classes):
    i = pl.program_id(0)

    @pl.when(i == 0)
    def _init():
        tp_ref[...] = jnp.zeros_like(tp_ref)
        s_ref[...] = jnp.zeros_like(s_ref)
        cnt_ref[...] = jnp.zeros_like(cnt_ref)

    logits = logits_ref[...].astype(jnp.float32)      # (TILE_N, C_pad)
    labels = labels_ref[...]                          # (TILE_N, 1) int32
    tn, cp = logits.shape

    # Softmax over classes.  Padded class columns hold -1e30 -> exp == 0, so
    # they contribute nothing to the denominator or to S / tp.
    m = jnp.max(logits, axis=1, keepdims=True)
    e = jnp.exp(logits - m)
    p = e / jnp.sum(e, axis=1, keepdims=True)         # exact recip (accuracy)

    # Row validity mask: padded batch rows carry label -1.
    valid = (labels >= 0).astype(jnp.float32)         # (TILE_N, 1)
    p = p * valid

    # One-hot via lane-index compare (label -1 never matches -> all-zero row).
    class_ids = jax.lax.broadcasted_iota(jnp.int32, (tn, cp), 1)
    y_true = (class_ids == labels).astype(jnp.float32)

    # Per-class batch reductions for this tile, accumulated across the grid.
    tp_ref[...] += jnp.sum(y_true * p, axis=0, keepdims=True)
    s_ref[...] += jnp.sum(p, axis=0, keepdims=True)
    cnt_ref[...] += jnp.sum(y_true, axis=0, keepdims=True)

    @pl.when(i == pl.num_programs(0) - 1)
    def _finalize():
        tp = tp_ref[...]
        s = s_ref[...]
        cnt = cnt_ref[...]
        fp = s - tp            # sum((1 - y_true) * p)
        fn = cnt - tp          # sum(y_true * (1 - p))
        precision = tp / (tp + fp + EPSILON)
        recall = tp / (tp + fn + EPSILON)
        f1 = 2.0 * precision * recall / (precision + recall + EPSILON)
        f1 = jnp.clip(f1, EPSILON, 1.0 - EPSILON)
        # Exclude padded classes from the mean; divide by the real class count.
        cls_mask = (jax.lax.broadcasted_iota(jnp.int32, (1, cp), 1)
                    < num_classes).astype(jnp.float32)
        f1_sum = jnp.sum(f1 * cls_mask)
        out_ref[...] = (1.0 - f1_sum / num_classes).reshape(1, 1)


def f1_loss(y_pred, y_true, classes, *, max_tile_n=1024,
            target_tile_bytes=2 << 20):
    """y_pred: (N, classes) float logits (f32 or bf16), y_true: (N,) int labels -> scalar f32."""
    assert y_pred.ndim == 2 and y_pred.shape[1] == classes
    assert y_true.ndim == 1 and y_true.shape[0] == y_pred.shape[0]
    n, c = y_pred.shape

    # Lane-dense class axis.
    c_pad = _round_up(max(c, 128), 128)

    # Tile the batch so one (TILE_N, C_pad) f32 tile is ~target_tile_bytes
    # (double-buffered by BlockSpec); clamp to the (padded) batch size.
    tile_n = max(8, (target_tile_bytes // (c_pad * 4)) // 8 * 8)
    tile_n = min(max_tile_n, tile_n)
    tile_n = min(tile_n, _round_up(n, 8))
    n_pad = _round_up(n, tile_n)

    logits = jnp.pad(y_pred, ((0, n_pad - n), (0, c_pad - c)),
                     constant_values=_NEG_LARGE)
    labels = jnp.pad(y_true.astype(jnp.int32), (0, n_pad - n),
                     constant_values=-1).reshape(-1, 1)

    grid = (n_pad // tile_n,)
    kernel = functools.partial(_f1_loss_kernel, num_classes=classes)

    out = pl.pallas_call(
        kernel,
        out_shape=jax.ShapeDtypeStruct((1, 1), jnp.float32),
        grid_spec=pltpu.PrefetchScalarGridSpec(
            num_scalar_prefetch=0,
            grid=grid,
            in_specs=[
                pl.BlockSpec((tile_n, c_pad), lambda i: (i, 0)),
                pl.BlockSpec((tile_n, 1), lambda i: (i, 0)),
            ],
            out_specs=pl.BlockSpec((1, 1), lambda i: (0, 0)),
            scratch_shapes=[
                pltpu.VMEM((1, c_pad), jnp.float32),   # tp
                pltpu.VMEM((1, c_pad), jnp.float32),   # sum softmax (S)
                pltpu.VMEM((1, c_pad), jnp.float32),   # one-hot count
            ],
        ),
        compiler_params=pltpu.CompilerParams(
            dimension_semantics=("arbitrary",),
        ),
    )(logits, labels)
    return out[0, 0]


def _f1_loss_ref(y_pred, y_true, classes):
    # Pure-JAX reference mirroring the PyTorch module.
    y_true_oh = jax.nn.one_hot(y_true, classes, dtype=jnp.float32)
    p = jax.nn.softmax(y_pred.astype(jnp.float32), axis=1)
    tp = jnp.sum(y_true_oh * p, axis=0)
    fp = jnp.sum((1 - y_true_oh) * p, axis=0)
    fn = jnp.sum(y_true_oh * (1 - p), axis=0)
    precision = tp / (tp + fp + EPSILON)
    recall = tp / (tp + fn + EPSILON)
    f1 = 2 * (precision * recall) / (precision + recall + EPSILON)
    f1 = jnp.clip(f1, EPSILON, 1 - EPSILON)
    return 1 - jnp.mean(f1)


if __name__ == "__main__":
    key = jax.random.PRNGKey(0)

    # Case 1: small shape from the module spec (single tile, padded classes).
    N, CLASSES = 8, 32
    k1, k2, k3, k4 = jax.random.split(key, 4)
    y_pred = jax.random.normal(k1, (N, CLASSES), dtype=jnp.float32)
    y_true = jax.random.randint(k2, (N,), 0, CLASSES, dtype=jnp.int32)
    loss = jax.block_until_ready(f1_loss(y_pred, y_true, CLASSES))
    ref = jax.block_until_ready(_f1_loss_ref(y_pred, y_true, CLASSES))
    assert jnp.allclose(loss, ref, atol=1e-5, rtol=1e-5), (loss, ref)

    # Case 2: exercise the multi-tile accumulator path with a ragged last tile
    # and padded class lanes (small max_tile_n to force several grid steps).
    N2, CLASSES2 = 300, 40
    y_pred2 = jax.random.normal(k3, (N2, CLASSES2), dtype=jnp.float32)
    y_true2 = jax.random.randint(k4, (N2,), 0, CLASSES2, dtype=jnp.int32)
    loss2 = jax.block_until_ready(
        f1_loss(y_pred2, y_true2, CLASSES2, max_tile_n=128))
    ref2 = jax.block_until_ready(_f1_loss_ref(y_pred2, y_true2, CLASSES2))
    assert jnp.allclose(loss2, ref2, atol=1e-5, rtol=1e-5), (loss2, ref2)

    print("KERNEL_OK")
</pallas_src>

<mosaic_0001>
module attributes {stable_mosaic.version = 11 : i64} {
  func.func @_f1_loss_kernel(%arg0: i32, %arg1: memref<8x128xf32, #tpu.memory_space<vmem>>, %arg2: memref<8x1xi32, #tpu.memory_space<vmem>>, %arg3: memref<1x1xf32, #tpu.memory_space<vmem>>, %arg4: memref<1x128xf32, #tpu.memory_space<vmem>>, %arg5: memref<1x128xf32, #tpu.memory_space<vmem>>, %arg6: memref<1x128xf32, #tpu.memory_space<vmem>>) attributes {dimension_semantics = [#tpu.dimension_semantics<arbitrary>], iteration_bounds = array<i64: 1>, scalar_prefetch = 0 : i64, scratch_operands = 3 : i64, tpu.core_type = #tpu.core_type<tc>, window_params = [{transform_indices = @transform_0, window_bounds = array<i64: 8, 128>}, {transform_indices = @transform_1, window_bounds = array<i64: 8, 1>}, {pipeline_mode = #tpu.pipeline_mode<synchronous>, transform_indices = @transform_2, window_bounds = array<i64: 1, 1>}]} {
    %c0_i32 = arith.constant 0 : i32
    %0 = arith.cmpi eq, %arg0, %c0_i32 : i32
    %1 = arith.extui %0 : i1 to i32
    %c0_i32_0 = arith.constant 0 : i32
    %2 = arith.cmpi ne, %1, %c0_i32_0 : i32
    scf.if %2 {
      %cst_23 = arith.constant 0.000000e+00 : f32
      %44 = vector.broadcast %cst_23 : f32 to vector<1x128xf32>
      %c0_24 = arith.constant 0 : index
      %c0_25 = arith.constant 0 : index
      %45 = vector.load %arg4[%c0_24, %c0_25] : memref<1x128xf32, #tpu.memory_space<vmem>>, vector<1x128xf32>
      tpu.vector_store %arg4[%c0_24, %c0_25], %44 {strides = array<i32>} : memref<1x128xf32, #tpu.memory_space<vmem>>, vector<1x128xf32>,
      %cst_26 = arith.constant 0.000000e+00 : f32
      %46 = vector.broadcast %cst_26 : f32 to vector<1x128xf32>
      %c0_27 = arith.constant 0 : index
      %c0_28 = arith.constant 0 : index
      %47 = vector.load %arg5[%c0_27, %c0_28] : memref<1x128xf32, #tpu.memory_space<vmem>>, vector<1x128xf32>
      tpu.vector_store %arg5[%c0_27, %c0_28], %46 {strides = array<i32>} : memref<1x128xf32, #tpu.memory_space<vmem>>, vector<1x128xf32>,
      %cst_29 = arith.constant 0.000000e+00 : f32
      %48 = vector.broadcast %cst_29 : f32 to vector<1x128xf32>
      %c0_30 = arith.constant 0 : index
      %c0_31 = arith.constant 0 : index
      %49 = vector.load %arg6[%c0_30, %c0_31] : memref<1x128xf32, #tpu.memory_space<vmem>>, vector<1x128xf32>
      tpu.vector_store %arg6[%c0_30, %c0_31], %48 {strides = array<i32>} : memref<1x128xf32, #tpu.memory_space<vmem>>, vector<1x128xf32>,
    } else {
    }
    %c0 = arith.constant 0 : index
    %c0_1 = arith.constant 0 : index
    %3 = vector.load %arg1[%c0, %c0_1] : memref<8x128xf32, #tpu.memory_space<vmem>>, vector<8x128xf32>
    %c0_2 = arith.constant 0 : index
    %c0_3 = arith.constant 0 : index
    %4 = vector.load %arg2[%c0_2, %c0_3] : memref<8x1xi32, #tpu.memory_space<vmem>>, vector<8x1xi32>
    %cst = arith.constant dense<0xFF800000> : vector<8xf32>
    %5 = vector.multi_reduction <maximumf>, %3, %cst [1] : vector<8x128xf32> to vector<8xf32>
    %6 = vector.shape_cast %5 : vector<8xf32> to vector<8x1xf32>
    %7 = vector.broadcast %6 : vector<8x1xf32> to vector<8x128xf32>
    %8 = arith.subf %3, %7 : vector<8x128xf32>
    %9 = math.exp %8 : vector<8x128xf32>
    %cst_4 = arith.constant dense<0.000000e+00> : vector<8xf32>
    %10 = vector.multi_reduction <add>, %9, %cst_4 [1] : vector<8x128xf32> to vector<8xf32>
    %11 = vector.shape_cast %10 : vector<8xf32> to vector<8x1xf32>
    %12 = vector.broadcast %11 : vector<8x1xf32> to vector<8x128xf32>
    %13 = arith.divf %9, %12 : vector<8x128xf32>
    %c0_i32_5 = arith.constant 0 : i32
    %14 = vector.broadcast %c0_i32_5 : i32 to vector<8x1xi32>
    %15 = arith.cmpi sge, %4, %14 : vector<8x1xi32>
    %16 = arith.extui %15 : vector<8x1xi1> to vector<8x1xi32>
    %17 = arith.sitofp %16 : vector<8x1xi32> to vector<8x1xf32>
    %18 = vector.broadcast %17 : vector<8x1xf32> to vector<8x128xf32>
    %19 = arith.mulf %13, %18 : vector<8x128xf32>
    %20 = tpu.iota {dimensions = array<i32: 1>} : vector<8x128xi32>
    %21 = vector.broadcast %4 : vector<8x1xi32> to vector<8x128xi32>
    %22 = arith.cmpi eq, %20, %21 : vector<8x128xi32>
    %23 = arith.extui %22 : vector<8x128xi1> to vector<8x128xi32>
    %24 = arith.sitofp %23 : vector<8x128xi32> to vector<8x128xf32>
    %c0_6 = arith.constant 0 : index
    %c0_7 = arith.constant 0 : index
    %25 = vector.load %arg4[%c0_6, %c0_7] : memref<1x128xf32, #tpu.memory_space<vmem>>, vector<1x128xf32>
    %26 = arith.mulf %24, %19 : vector<8x128xf32>
    %cst_8 = arith.constant dense<0.000000e+00> : vector<128xf32>
    %27 = vector.multi_reduction <add>, %26, %cst_8 [0] : vector<8x128xf32> to vector<128xf32>
    %28 = vector.shape_cast %27 : vector<128xf32> to vector<1x128xf32>
    %29 = arith.addf %25, %28 : vector<1x128xf32>
    %c0_9 = arith.constant 0 : index
    %c0_10 = arith.constant 0 : index
    %30 = vector.load %arg4[%c0_9, %c0_10] : memref<1x128xf32, #tpu.memory_space<vmem>>, vector<1x128xf32>
    tpu.vector_store %arg4[%c0_9, %c0_10], %29 {strides = array<i32>} : memref<1x128xf32, #tpu.memory_space<vmem>>, vector<1x128xf32>,
    %c0_11 = arith.constant 0 : index
    %c0_12 = arith.constant 0 : index
    %31 = vector.load %arg5[%c0_11, %c0_12] : memref<1x128xf32, #tpu.memory_space<vmem>>, vector<1x128xf32>
    %cst_13 = arith.constant dense<0.000000e+00> : vector<128xf32>
    %32 = vector.multi_reduction <add>, %19, %cst_13 [0] : vector<8x128xf32> to vector<128xf32>
    %33 = vector.shape_cast %32 : vector<128xf32> to vector<1x128xf32>
    %34 = arith.addf %31, %33 : vector<1x128xf32>
    %c0_14 = arith.constant 0 : index
    %c0_15 = arith.constant 0 : index
    %35 = vector.load %arg5[%c0_14, %c0_15] : memref<1x128xf32, #tpu.memory_space<vmem>>, vector<1x128xf32>
    tpu.vector_store %arg5[%c0_14, %c0_15], %34 {strides = array<i32>} : memref<1x128xf32, #tpu.memory_space<vmem>>, vector<1x128xf32>,
    %c0_16 = arith.constant 0 : index
    %c0_17 = arith.constant 0 : index
    %36 = vector.load %arg6[%c0_16, %c0_17] : memref<1x128xf32, #tpu.memory_space<vmem>>, vector<1x128xf32>
    %cst_18 = arith.constant dense<0.000000e+00> : vector<128xf32>
    %37 = vector.multi_reduction <add>, %24, %cst_18 [0] : vector<8x128xf32> to vector<128xf32>
    %38 = vector.shape_cast %37 : vector<128xf32> to vector<1x128xf32>
    %39 = arith.addf %36, %38 : vector<1x128xf32>
    %c0_19 = arith.constant 0 : index
    %c0_20 = arith.constant 0 : index
    %40 = vector.load %arg6[%c0_19, %c0_20] : memref<1x128xf32, #tpu.memory_space<vmem>>, vector<1x128xf32>
    tpu.vector_store %arg6[%c0_19, %c0_20], %39 {strides = array<i32>} : memref<1x128xf32, #tpu.memory_space<vmem>>, vector<1x128xf32>,
    %c0_i32_21 = arith.constant 0 : i32
    %41 = arith.cmpi eq, %arg0, %c0_i32_21 : i32
    %42 = arith.extui %41 : i1 to i32
    %c0_i32_22 = arith.constant 0 : i32
    %43 = arith.cmpi ne, %42, %c0_i32_22 : i32
    scf.if %43 {
      %c0_23 = arith.constant 0 : index
      %c0_24 = arith.constant 0 : index
      %44 = vector.load %arg4[%c0_23, %c0_24] : memref<1x128xf32, #tpu.memory_space<vmem>>, vector<1x128xf32>
      %c0_25 = arith.constant 0 : index
      %c0_26 = arith.constant 0 : index
      %45 = vector.load %arg5[%c0_25, %c0_26] : memref<1x128xf32, #tpu.memory_space<vmem>>, vector<1x128xf32>
      %c0_27 = arith.constant 0 : index
      %c0_28 = arith.constant 0 : index
      %46 = vector.load %arg6[%c0_27, %c0_28] : memref<1x128xf32, #tpu.memory_space<vmem>>, vector<1x128xf32>
      %47 = arith.subf %45, %44 : vector<1x128xf32>
      %48 = arith.subf %46, %44 : vector<1x128xf32>
      %49 = arith.addf %44, %47 : vector<1x128xf32>
      %cst_29 = arith.constant 1.000000e-07 : f32
      %50 = vector.broadcast %cst_29 : f32 to vector<1x128xf32>
      %51 = arith.addf %49, %50 : vector<1x128xf32>
      %52 = arith.divf %44, %51 : vector<1x128xf32>
      %53 = arith.addf %44, %48 : vector<1x128xf32>
      %cst_30 = arith.constant 1.000000e-07 : f32
      %54 = vector.broadcast %cst_30 : f32 to vector<1x128xf32>
      %55 = arith.addf %53, %54 : vector<1x128xf32>
      %56 = arith.divf %44, %55 : vector<1x128xf32>
      %cst_31 = arith.constant 2.000000e+00 : f32
      %57 = vector.broadcast %cst_31 : f32 to vector<1x128xf32>
      %58 = arith.mulf %57, %52 : vector<1x128xf32>
      %59 = arith.mulf %58, %56 : vector<1x128xf32>
      %60 = arith.addf %52, %56 : vector<1x128xf32>
      %cst_32 = arith.constant 1.000000e-07 : f32
      %61 = vector.broadcast %cst_32 : f32 to vector<1x128xf32>
      %62 = arith.addf %60, %61 : vector<1x128xf32>
      %63 = arith.divf %59, %62 : vector<1x128xf32>
      %cst_33 = arith.constant 1.000000e-07 : f32
      %cst_34 = arith.constant 0.99999988 : f32
      %64 = vector.broadcast %cst_33 : f32 to vector<1x128xf32>
      %65 = arith.maximumf %64, %63 : vector<1x128xf32>
      %66 = vector.broadcast %cst_34 : f32 to vector<1x128xf32>
      %67 = arith.minimumf %66, %65 : vector<1x128xf32>
      %68 = tpu.iota {dimensions = array<i32: 1>} : vector<1x128xi32>
      %c32_i32 = arith.constant 32 : i32
      %69 = vector.broadcast %c32_i32 : i32 to vector<1x128xi32>
      %70 = arith.cmpi slt, %68, %69 : vector<1x128xi32>
      %71 = arith.extui %70 : vector<1x128xi1> to vector<1x128xi32>
      %72 = arith.sitofp %71 : vector<1x128xi32> to vector<1x128xf32>
      %73 = arith.mulf %67, %72 : vector<1x128xf32>
      %74 = vector.shape_cast %73 : vector<1x128xf32> to vector<1x1x128xf32>
      %cst_35 = arith.constant dense<0.000000e+00> : vector<1xf32>
      %75 = vector.multi_reduction <add>, %74, %cst_35 [1, 2] : vector<1x1x128xf32> to vector<1xf32>
      %76 = vector.shape_cast %75 : vector<1xf32> to vector<1x1x1xf32>
      %77 = vector.extract %76[0, 0, 0] : f32 from vector<1x1x1xf32>
      %cst_36 = arith.constant 3.200000e+01 : f32
      %78 = arith.divf %77, %cst_36 : f32
      %cst_37 = arith.constant 1.000000e+00 : f32
      %79 = arith.subf %cst_37, %78 : f32
      %80 = vector.broadcast %79 : f32 to vector<1x1xf32>
      %c0_38 = arith.constant 0 : index
      %c0_39 = arith.constant 0 : index
      %81 = vector.load %arg3[%c0_38, %c0_39] : memref<1x1xf32, #tpu.memory_space<vmem>>, vector<1x1xf32>
      tpu.vector_store %arg3[%c0_38, %c0_39], %80 {strides = array<i32>} : memref<1x1xf32, #tpu.memory_space<vmem>>, vector<1x1xf32>,
    } else {
    }
    return
  }
  func.func @transform_0(%arg0: i32) -> (i32, i32) {
    %c0_i32 = arith.constant 0 : i32
    %c0_i32_0 = arith.constant 0 : i32
    return %arg0, %c0_i32 : i32, i32
  }
  func.func @transform_1(%arg0: i32) -> (i32, i32) {
    %c0_i32 = arith.constant 0 : i32
    %c0_i32_0 = arith.constant 0 : i32
    return %arg0, %c0_i32 : i32, i32
  }
  func.func @transform_2(%arg0: i32) -> (i32, i32) {
    %c0_i32 = arith.constant 0 : i32
    %c0_i32_0 = arith.constant 0 : i32
    %c0_i32_1 = arith.constant 0 : i32
    return %c0_i32, %c0_i32_0 : i32, i32
  }
}

</mosaic_0001>

<bundles_post_ra>
// kernel: tpu_custom_call.1
= control target key start
LH: loop header
LB: loop body
LE: loop exit
PB: predicated region body
PF: predicated region fallthrough
CT: control target
= control target key end

     0   :  { %s284_s0 = inlined_call_operand.vmem [shape: f32[8,128], index: 0, kind: input, shape index: {}]   ;;  %s285_s1 = inlined_call_operand.vmem [shape: s32[8,1], index: 1, kind: input, shape index: {}]   ;;  %s286_s2 = inlined_call_operand.hbm [shape: f32[1,1], index: 2, kind: output, shape index: {}]  }
   0x1   :  { %v19_v0 = vld [vmem:[%s284_s0] sm:$0xff] }
   0x2   :  { %7 = vsyncpa [#allocation6], 0  ;;  %21 = vmax.xlane.f32.xlu0 %v19_v0  ;;  %v20_v1 = vld [vmem:[%s285_s1] sm:$0xff]  ;;  %v246_v2 = vmov 0   ;;  %v247_v3 = vmov 0.0   ;;  %v52_v10 = vlaneseq  ;;  %s249_s13 = smov [#allocation5]  }
   0x3   :  { %206 = vset.pattern.permute.xlu1 %v246_v2  ;;  %vm43_vm0 = vcmp.ge.s32.totalorder %v20_v1, 0  ;;  %17 = vst [vmem:[#allocation3] sm:$0x1] %v247_v3  ;;  %207 = vset.pattern.permute.xlu0 %v246_v2  ;;  %s184_s14 = sshll.u32 %s249_s13, 4  ;;  %s186_s18 = sshll.u32 %s286_s2, 4  ;;  %s185_s14 = int_to_ptr.vmem [resolvable:$true] %s184_s14  ;;  %s187_s18 = int_to_ptr.hbm [resolvable:$true] %s186_s18 }
   0x4   :  { %v195_v4 = vsel %vm43_vm0, 1.0, %v247_v3  ;;  %16 = vst [vmem:[#allocation2] sm:$0x1] %v247_v3  ;;  %v275_v11 = vand.u32 127, %v52_v10 }
   0x5   :  { %48 = vperm.xlu1 %206, %v195_v4   ;;  %18 = vst [vmem:[#allocation4] sm:$0x1] %v247_v3 }
   0xa   :  { %v70_v45 = vld [vmem:[#allocation3] sm:$0x1] }
   0xb   :  { %v60_v48 = vld [vmem:[#allocation2] sm:$0x1] }
   0xc   :  { %v79_v20 = vld [vmem:[#allocation4] sm:$0x1] }
   0xd   :  { %55 = vperm.xlu1 %206, %v20_v1  }
  0x75   :  { %v22_v5 = vpop.xlane.xlu0 %21 }
  0x76   :  { %v23_v6 = vsub.f32 %v19_v0, %v22_v5 }
  0x77   :  { %v49_v9 = vpop.permute.xlu1 %48 }
  0x78   :  { %v24_v7 = vmul.f32 1.442695, %v23_v6 }
  0x7a   :  { %208 = vpow2.f32 %v24_v7 }
  0x7f   :  { %v56_v12 = vpop.permute.xlu1 %55 }
  0x80   :  { %v209_v8 = vpop.eup %208  ;;  %vm57_vm1 = vcmp.eq.s32.totalorder %v275_v11, %v56_v12 }
  0x81   :  { %26 = vadd.xlane.f32.xlu0 %v209_v8  ;;  %v196_v13 = vsel %vm57_vm1, 1.0, %v247_v3 }
  0x82   :  { %v80_v14 = vrot.slane %v196_v13, 4 }
  0x84   :  { %v81_v15 = vadd.f32 %v196_v13, %v80_v14 }
  0x86   :  { %v82_v16 = vrot.slane %v81_v15, 2 }
  0x88   :  { %v83_v17 = vadd.f32 %v82_v16, %v81_v15 }
  0x8a   :  { %v84_v18 = vrot.slane %v83_v17, 1 }
  0x8c   :  { %v85_v19 = vadd.f32 %v84_v18, %v83_v17 }
  0x8e   :  { %v86_v21 = vadd.f32 %v85_v19, %v79_v20 }
  0x90   :  { %87 = vst [vmem:[#allocation4] sm:$0x1] %v86_v21 }
  0x97   :  { %v93_v54 = vld [vmem:[#allocation4] sm:$0x1] }
  0xf4   :  { %v27_v22 = vpop.xlane.xlu0 %26 }
  0xf5   :  { %210 = vrcp.f32 %v27_v22  ;;  %v39_v26 = vand.u32 2147483648, %v27_v22  ;;  %v37_v28 = vand.u32 2147483647, %v27_v22  ;;  %vm33_vm3 = vweird.f32 %v27_v22 }
  0xf7   :  { %v40_v30 = vor.u32 1.1754944e-38, %v39_v26  ;;  %vm38_vm5 = vcmp.eq.f32.partialorder %v37_v28, 8.507059e+37 }
  0xfb   :  { %v211_v23 = vpop.eup %210 }
  0xfc   :  { %v29_v24 = vmul.f32 %v211_v23, %v27_v22  ;;  %vm34_vm2 = vweird.f32 %v211_v23 }
  0xfd   :  { %vm35_vm4 = vmor %vm33_vm3, %vm34_vm2  ;;  %vm151_vm2 = vcmp.lt.s32.totalorder %v275_v11, 32  ;;  %vm155_vm3 = vcmask 1040384  }
  0xfe   :  { %v30_v25 = vsub.f32 1.0, %v29_v24 }
 0x100   :  { %v31_v27 = vmul.f32 %v211_v23, %v30_v25 }
 0x102   :  { %v32_v29 = vadd.f32 %v211_v23, %v31_v27 }
 0x104   :  { %v36_v31 = vsel %vm35_vm4, %v211_v23, %v32_v29 }
 0x105   :  { %v41_v32 = vsel %vm38_vm5, %v40_v30, %v36_v31  ;;  %vm177_vm5 = vcmask 0  }
 0x106   :  { %v42_v33 = vmul.f32 %v209_v8, %v41_v32 }
 0x108   :  { %v51_v34 = vmul.f32 %v49_v9, %v42_v33 }
 0x10a   :  { %v71_v35 = vrot.slane %v51_v34, 4  ;;  %v61_v36 = vmul.f32 %v196_v13, %v51_v34 }
 0x10c   :  { %v72_v37 = vadd.f32 %v71_v35, %v51_v34  ;;  %v62_v38 = vrot.slane %v61_v36, 4 }
 0x10e   :  { %v73_v39 = vrot.slane %v72_v37, 2  ;;  %v63_v40 = vadd.f32 %v62_v38, %v61_v36 }
 0x110   :  { %v74_v41 = vadd.f32 %v73_v39, %v72_v37  ;;  %v64_v42 = vrot.slane %v63_v40, 2  ;;  %v197_v37 = vsel %vm151_vm2, 1.0, %v247_v3 }
 0x112   :  { %v75_v43 = vrot.slane %v74_v41, 1  ;;  %v65_v44 = vadd.f32 %v64_v42, %v63_v40 }
 0x114   :  { %v76_v46 = vadd.f32 %v75_v43, %v74_v41  ;;  %v66_v47 = vrot.slane %v65_v44, 1  ;;  %v248_v41 = vmov 32.0  }
 0x116   :  { %v67_v49 = vadd.f32 %v66_v47, %v65_v44  ;;  %v77_v50 = vadd.f32 %v76_v46, %v70_v45 }
 0x118   :  { %v68_v51 = vadd.f32 %v67_v49, %v60_v48  ;;  %78 = vst [vmem:[#allocation3] sm:$0x1] %v77_v50 }
 0x11a   :  { %69 = vst [vmem:[#allocation2] sm:$0x1] %v68_v51 }
 0x11f   :  { %v92_v53 = vld [vmem:[#allocation3] sm:$0x1] }
 0x121   :  { %v91_v52 = vld [vmem:[#allocation2] sm:$0x1] }
 0x122   :  { %v94_v55 = vsub.f32 %v92_v53, %v91_v52  ;;  %v95_v56 = vsub.f32 %v93_v54, %v91_v52 }
 0x124   :  { %v96_v57 = vadd.f32 %v94_v55, %v91_v52  ;;  %v113_v58 = vadd.f32 %v95_v56, %v91_v52 }
 0x126   :  { %v97_v59 = vadd.f32 1e-07, %v96_v57  ;;  %v114_v60 = vadd.f32 1e-07, %v113_v58 }
 0x128   :  { %212 = vrcp.f32 %v97_v59  ;;  %v109_v2 = vand.u32 2147483648, %v97_v59  ;;  %v107_v6 = vand.u32 2147483647, %v97_v59  ;;  %v126_v7 = vand.u32 2147483648, %v114_v60 }
 0x129   :  { %214 = vrcp.f32 %v114_v60  ;;  %v124_v9 = vand.u32 2147483647, %v114_v60  ;;  %vm103_vm8 = vweird.f32 %v97_v59  ;;  %vm120_vm10 = vweird.f32 %v114_v60 }
 0x12a   :  { %v110_v12 = vor.u32 1.1754944e-38, %v109_v2  ;;  %vm108_vm11 = vcmp.eq.f32.partialorder %v107_v6, 8.507059e+37  ;;  %v127_v15 = vor.u32 1.1754944e-38, %v126_v7 }
 0x12b   :  { %vm125_vm13 = vcmp.eq.f32.partialorder %v124_v9, 8.507059e+37 }
 0x12e   :  { %v213_v61 = vpop.eup %212 }
 0x12f   :  { %v215_v62 = vpop.eup %214  ;;  %v99_v63 = vmul.f32 %v213_v61, %v97_v59  ;;  %vm104_vm6 = vweird.f32 %v213_v61 }
 0x130   :  { %v116_v0 = vmul.f32 %v215_v62, %v114_v60  ;;  %vm121_vm7 = vweird.f32 %v215_v62  ;;  %vm105_vm9 = vmor %vm103_vm8, %vm104_vm6 }
 0x131   :  { %v100_v1 = vsub.f32 1.0, %v99_v63  ;;  %vm122_vm12 = vmor %vm120_vm10, %vm121_vm7 }
 0x132   :  { %v117_v4 = vsub.f32 1.0, %v116_v0 }
 0x133   :  { %v101_v5 = vmul.f32 %v213_v61, %v100_v1 }
 0x134   :  { %v118_v8 = vmul.f32 %v215_v62, %v117_v4 }
 0x135   :  { %v102_v10 = vadd.f32 %v213_v61, %v101_v5 }
 0x136   :  { %v119_v13 = vadd.f32 %v215_v62, %v118_v8 }
 0x137   :  { %v106_v14 = vsel %vm105_vm9, %v213_v61, %v102_v10 }
 0x138   :  { %v111_v16 = vsel %vm108_vm11, %v110_v12, %v106_v14  ;;  %v123_v17 = vsel %vm122_vm12, %v215_v62, %v119_v13 }
 0x139   :  { %v112_v18 = vmul.f32 %v111_v16, %v91_v52  ;;  %v128_v19 = vsel %vm125_vm13, %v127_v15, %v123_v17 }
 0x13a   :  { %v129_v20 = vmul.f32 %v128_v19, %v91_v52 }
 0x13b   :  { %v130_v27 = vmul.f32 2.0, %v112_v18 }
 0x13c   :  { %v132_v21 = vadd.f32 %v129_v20, %v112_v18 }
 0x13d   :  { %v131_v32 = vmul.f32 %v130_v27, %v129_v20 }
 0x13e   :  { %v133_v22 = vadd.f32 1e-07, %v132_v21 }
 0x140   :  { %216 = vrcp.f32 %v133_v22  ;;  %v145_v26 = vand.u32 2147483648, %v133_v22  ;;  %v143_v29 = vand.u32 2147483647, %v133_v22  ;;  %vm139_vm15 = vweird.f32 %v133_v22 }
 0x141   :  { %218 = vrcp.f32 %v248_v41 }
 0x142   :  { %v146_v31 = vor.u32 1.1754944e-38, %v145_v26  ;;  %vm144_vm1 = vcmp.eq.f32.partialorder %v143_v29, 8.507059e+37 }
 0x146   :  { %v217_v23 = vpop.eup %216 }
 0x147   :  { %v135_v24 = vmul.f32 %v217_v23, %v133_v22  ;;  %vm140_vm14 = vweird.f32 %v217_v23  ;;  %v219_v42 = vpop.eup %218 }
 0x148   :  { %vm141_vm0 = vmor %vm139_vm15, %vm140_vm14  ;;  %v167_v43 = vmul.f32 32.0, %v219_v42  ;;  %vm171_vm4 = vweird.f32 %v219_v42 }
 0x149   :  { %v136_v25 = vsub.f32 1.0, %v135_v24 }
 0x14a   :  { %v168_v44 = vsub.f32 1.0, %v167_v43 }
 0x14b   :  { %v137_v28 = vmul.f32 %v217_v23, %v136_v25 }
 0x14c   :  { %v169_v48 = vmul.f32 %v219_v42, %v168_v44 }
 0x14d   :  { %v138_v30 = vadd.f32 %v217_v23, %v137_v28 }
 0x14e   :  { %v170_v11 = vadd.f32 %v219_v42, %v169_v48 }
 0x14f   :  { %v142_v33 = vsel %vm141_vm0, %v217_v23, %v138_v30 }
 0x150   :  { %v147_v34 = vsel %vm144_vm1, %v146_v31, %v142_v33  ;;  %v172_v52 = vsel %vm171_vm4, %v219_v42, %v170_v11 }
 0x151   :  { %v148_v35 = vmul.f32 %v147_v34, %v131_v32 }
 0x153   :  { %v149_v36 = vmax.f32 %v148_v35, 1e-07 }
 0x155   :  { %v150_v38 = vmin.f32 %v149_v36, 0.9999999 }
 0x157   :  { %v154_v39 = vmul.f32 %v197_v37, %v150_v38 }
 0x159   :  { %v156_v40 = vsel %vm155_vm3, %v154_v39, 0.0 }
 0x15a   :  { %157 = vadd.xlane.f32.xlu2 %v156_v40 }
 0x1cd   :  { %v158_v45 = vpop.xlane.xlu2 %157 }
 0x1ce   :  { %v159_v46 = vrot.slane %v158_v45, 4 }
 0x1d0   :  { %v160_v47 = vadd.f32 %v159_v46, %v158_v45 }
 0x1d2   :  { %v161_v49 = vrot.slane %v160_v47, 2 }
 0x1d4   :  { %v162_v50 = vadd.f32 %v161_v49, %v160_v47 }
 0x1d6   :  { %v163_v51 = vrot.slane %v162_v50, 1 }
 0x1d8   :  { %v164_v3 = vadd.f32 %v163_v51, %v162_v50 }
 0x1da   :  { %198 = vpush %v164_v3 }
 0x1db   :  { %200 = vpush %v172_v52 }
 0x20b   :  { %s199_s0 = spop %198 }
 0x20c   :  { %s201_s1 = spop %200 }
 0x20d   :  { %s174_s15 = smul.f32 %s201_s1, %s199_s0 }
 0x20f   :  { %s175_s19 = ssub.f32 1.0, %s174_s15 }
 0x211   :  { %v176_v53 = vstv %s175_s19 }
 0x212   :  { %178 = vst.msk [vmem:[#allocation5] sm:$0x1] %vm177_vm5, %v176_v53 }
 0x213   :  { %189 = dma.vmem_to_hbm [thread:$0]  %s185_s14, 16, %s187_s18, [#allocation6]  }
 0x214   :  { %244 = dma.done.wait [#allocation6], 16  }
 0x215   :  { %245 = vsyncadd [#allocation6], 4294967280 }
 0x216   :  { %194 = vsyncpa [#allocation6], 1 }

</bundles_post_ra>
